<compile_context>
chip_gen: v7x
topology: tpu7x:2x2x1
jax: 0.10.0
libtpu: 0.0.40
codegen_flags: <defaults>
</compile_context>

<pallas_src>
import functools

import jax
import jax.numpy as jnp
from jax.experimental import pallas as pl
from jax.experimental.pallas import tpu as pltpu


# --------------------------------------------------------------------------- math ----

def _focal_elementwise(x, t, alpha, gamma, hard_targets):
    """Numerically stable focal-loss math in f32 (matches the PyTorch module)."""
    x = x.astype(jnp.float32)
    t = t.astype(jnp.float32)
    u = jnp.exp(-jnp.abs(x))                                   # EUP transcendental #1
    # BCE with logits: max(x, 0) - x*t + log1p(exp(-|x|))
    bce = jnp.maximum(x, 0.0) - x * t + jnp.log1p(u)           # EUP transcendental #2

    if hard_targets:
        # For hard {0,1} targets: pt = exp(-bce) == p^t (1-p)^(1-t) == t*p + (1-t)*(1-p)
        # with p = sigmoid(x). Reuses u, dropping the second exp (2 EUP ops/element).
        r = pl.reciprocal(1.0 + u, approx=True)
        r = r * (2.0 - (1.0 + u) * r)        # one Newton step (VPU) -> ~f32 accuracy
        p = jnp.where(x >= 0.0, 1.0, u) * r  # sigmoid(x)
        pt = t * p + (1.0 - t) * (1.0 - p)
    else:
        pt = jnp.exp(-bce)                   # exact also for soft labels (EUP #3)

    one_m_pt = 1.0 - pt
    g = float(gamma)
    if g == int(g) and 0.0 <= g <= 8.0:
        gi = int(g)
        if gi == 0:
            return alpha * bce
        mod = one_m_pt
        for _ in range(gi - 1):
            mod = mod * one_m_pt             # small integer exponent -> chained multiplies
    else:
        mod = jnp.power(one_m_pt, g)
    return (alpha * mod) * bce


# ------------------------------------------------------------------------ kernels ----

def _focal_sum_kernel(x_ref, t_ref, out_ref, *, alpha, gamma, hard_targets):
    """Per-row-block partial sums, accumulated over the column (j) grid axis."""
    j = pl.program_id(1)

    @pl.when(j == 0)
    def _init():
        out_ref[...] = jnp.zeros_like(out_ref)

    f = _focal_elementwise(x_ref[...], t_ref[...], alpha, gamma, hard_targets)
    acc_rows = out_ref.shape[1]
    tile_n = f.shape[-1]
    # Sublane-aligned regroup; reduction over the leading axis = whole-vreg VPU adds.
    part = f.reshape(-1, acc_rows, tile_n).sum(axis=0)          # (acc_rows, tile_n)
    out_ref[...] += part[None]


def _focal_none_kernel(x_ref, t_ref, o_ref, *, alpha, gamma, hard_targets):
    f = _focal_elementwise(x_ref[...], t_ref[...], alpha, gamma, hard_targets)
    o_ref[...] = f.astype(o_ref.dtype)


# ------------------------------------------------------------------- tile planning ---

def _largest_divisor(n, cap, multiple_of=1):
    """Largest d with d | n, d <= cap, d % multiple_of == 0 (0 if none exists)."""
    best = 0
    d = 1
    while d * d <= n:
        if n % d == 0:
            for c in (d, n // d):
                if c <= cap and c % multiple_of == 0 and c > best:
                    best = c
        d += 1
    return best


_BLOCK_BUDGET = 4 * 1024 * 1024  # ~4 MiB per input block (x 2 inputs x 2 pipeline bufs)


def _pick_tiles(M, N, itemsize, *, want_row_split):
    # Column tile: lane-dense (multiple of 128), not so wide that 8 rows bust the budget.
    n_cap = max(128, _BLOCK_BUDGET // (8 * itemsize))
    if N % 128 == 0:
        tile_n = _largest_divisor(N, min(N, n_cap), multiple_of=128) or N
    else:
        tile_n = N if N * 8 * itemsize <= _BLOCK_BUDGET else (_largest_divisor(N, n_cap) or N)

    # Row tile: fill the per-block budget from the *actual* itemsize (bf16 doubles rows);
    # prefer multiples of 8 so the partial-sum reduction stays on the VPU path.
    budget_rows = max(8, _BLOCK_BUDGET // (tile_n * itemsize))
    tile_m = _largest_divisor(M, min(M, budget_rows), multiple_of=8)
    if tile_m == 0:
        tile_m = _largest_divisor(M, min(M, budget_rows)) or M

    # Megacore (v7x: 2 TensorCores): make sure the 'parallel' row axis has >= 2 blocks.
    if want_row_split and (M // tile_m) < 2 and tile_m % 16 == 0:
        tile_m //= 2
    return tile_m, tile_n


def _vmem_limit_bytes(in_block_bytes, out_block_bytes):
    # 2 inputs x 2 pipeline buffers + 2 output buffers, plus generous margin for
    # Mosaic's f32 elementwise temporaries. Clamped below v7x's 64 MiB physical VMEM;
    # v5e/v6e have 128 MiB physical so this only raises their 16/32 MiB scoped default.
    footprint = 2 * 2 * in_block_bytes + 2 * out_block_bytes
    return int(min(max(2 * footprint + (8 << 20), 32 << 20), 48 << 20))


# ------------------------------------------------------------------------ wrapper ----

def focal_loss(inputs, targets, alpha=0.25, gamma=2.0, reduction="mean",
               hard_targets=False, tile_m=None, tile_n=None):
    """Pallas focal loss. inputs/targets: 2-D arrays of identical shape [rows, cols].

    hard_targets=True enables the 2-transcendental path (exact only for {0,1} targets).
    """
    assert inputs.shape == targets.shape
    assert inputs.ndim == 2, "flatten inputs/targets to 2-D [rows, cols]"
    M, N = inputs.shape
    itemsize = jnp.dtype(inputs.dtype).itemsize

    auto_m, auto_n = _pick_tiles(M, N, itemsize, want_row_split=True)
    tile_m = auto_m if tile_m is None else tile_m
    tile_n = auto_n if tile_n is None else tile_n
    assert M % tile_m == 0 and N % tile_n == 0, (
        "pad inputs to tile multiples (NOTE: zero padding is NOT loss-neutral: each "
        "padded x=0,t=0 element adds alpha*0.25*log(2) to the sum; mask if you pad)")

    grid = (M // tile_m, N // tile_n)
    in_specs = [
        pl.BlockSpec((tile_m, tile_n), lambda i, j: (i, j)),
        pl.BlockSpec((tile_m, tile_n), lambda i, j: (i, j)),
    ]
    in_block_bytes = tile_m * tile_n * itemsize

    if reduction == "none":
        out_dtype = inputs.dtype  # bf16 in -> bf16 out: halves the HBM write stream
        out_block_bytes = tile_m * tile_n * jnp.dtype(out_dtype).itemsize
        kernel = functools.partial(_focal_none_kernel, alpha=float(alpha),
                                   gamma=float(gamma), hard_targets=hard_targets)
        return pl.pallas_call(
            kernel,
            out_shape=jax.ShapeDtypeStruct((M, N), out_dtype),
            grid_spec=pltpu.PrefetchScalarGridSpec(
                num_scalar_prefetch=0,
                grid=grid,
                in_specs=in_specs,
                out_specs=pl.BlockSpec((tile_m, tile_n), lambda i, j: (i, j)),
            ),
            compiler_params=pltpu.CompilerParams(
                dimension_semantics=("parallel", "parallel"),
                vmem_limit_bytes=_vmem_limit_bytes(in_block_bytes, out_block_bytes)),
        )(inputs, targets)

    if reduction not in ("mean", "sum"):
        raise ValueError(f"unknown reduction {reduction!r}")

    # mean / sum: per-row-block (acc_rows, tile_n) partial-sum slab, reduced in wrapper.
    acc_rows = 8 if tile_m % 8 == 0 else 1
    out_block_bytes = acc_rows * tile_n * 4
    kernel = functools.partial(_focal_sum_kernel, alpha=float(alpha),
                               gamma=float(gamma), hard_targets=hard_targets)
    partials = pl.pallas_call(
        kernel,
        out_shape=jax.ShapeDtypeStruct((M // tile_m, acc_rows, tile_n), jnp.float32),
        grid_spec=pltpu.PrefetchScalarGridSpec(
            num_scalar_prefetch=0,
            grid=grid,
            in_specs=in_specs,
            out_specs=pl.BlockSpec((1, acc_rows, tile_n), lambda i, j: (i, 0, 0)),
        ),
        compiler_params=pltpu.CompilerParams(
            dimension_semantics=("parallel", "arbitrary"),
            vmem_limit_bytes=_vmem_limit_bytes(in_block_bytes, out_block_bytes)),
    )(inputs, targets)

    total = jnp.sum(partials)  # tiny final reduce: num_row_blocks * acc_rows * tile_n
    if reduction == "mean":
        return total / (M * N)
    return total


# ---------------------------------------------------------------------- reference ----

def _focal_loss_ref(inputs, targets, alpha=0.25, gamma=2.0, reduction="mean"):
    x = inputs.astype(jnp.float32)
    t = targets.astype(jnp.float32)
    bce = jnp.maximum(x, 0.0) - x * t + jnp.log1p(jnp.exp(-jnp.abs(x)))
    pt = jnp.exp(-bce)
    f = alpha * (1.0 - pt) ** gamma * bce
    if reduction == "mean":
        return jnp.mean(f)
    if reduction == "sum":
        return jnp.sum(f)
    return f


if __name__ == "__main__":
    key = jax.random.PRNGKey(0)
    k1, k2 = jax.random.split(key)

    # Small shapes consistent with a multi-label classifier head: [batch=16, labels=256]
    M, N = 16, 256
    logits = jax.random.normal(k1, (M, N), dtype=jnp.float32) * 2.0
    targets = (jax.random.uniform(k2, (M, N)) > 0.5).astype(jnp.float32)

    ref_mean = _focal_loss_ref(logits, targets, reduction="mean")
    ref_sum = _focal_loss_ref(logits, targets, reduction="sum")
    ref_none = _focal_loss_ref(logits, targets, reduction="none")

    out_mean = jax.block_until_ready(
        focal_loss(logits, targets, alpha=0.25, gamma=2.0, reduction="mean"))
    assert jnp.allclose(out_mean, ref_mean, rtol=1e-5, atol=1e-6), (out_mean, ref_mean)

    out_sum = jax.block_until_ready(
        focal_loss(logits, targets, alpha=0.25, gamma=2.0, reduction="sum"))
    assert jnp.allclose(out_sum, ref_sum, rtol=1e-5, atol=1e-3), (out_sum, ref_sum)

    out_none = jax.block_until_ready(
        focal_loss(logits, targets, alpha=0.25, gamma=2.0, reduction="none"))
    assert jnp.allclose(out_none, ref_none, rtol=1e-4, atol=1e-5)

    # Hard-target fast path: 2 EUP transcendentals/element instead of 3 (targets are {0,1}).
    out_mean_h = jax.block_until_ready(
        focal_loss(logits, targets, reduction="mean", hard_targets=True))
    assert jnp.allclose(out_mean_h, ref_mean, rtol=1e-4, atol=1e-5), (out_mean_h, ref_mean)

    # bf16 inputs: rows double under the same VMEM budget; 'none' output is bf16.
    lb = logits.astype(jnp.bfloat16)
    tb = targets.astype(jnp.bfloat16)
    out_none_bf16 = jax.block_until_ready(focal_loss(lb, tb, reduction="none"))
    assert out_none_bf16.dtype == jnp.bfloat16
    assert jnp.allclose(out_none_bf16.astype(jnp.float32),
                        _focal_loss_ref(lb, tb, reduction="none"),
                        rtol=2e-2, atol=2e-2)

    print("KERNEL_OK")
</pallas_src>

<mosaic_0001>
module attributes {stable_mosaic.version = 11 : i64} {
  func.func @_focal_sum_kernel(%arg0: i32, %arg1: i32, %arg2: memref<8x256xf32, #tpu.memory_space<vmem>>, %arg3: memref<8x256xf32, #tpu.memory_space<vmem>>, %arg4: memref<1x8x256xf32, #tpu.memory_space<vmem>>) attributes {dimension_semantics = [#tpu.dimension_semantics<parallel>, #tpu.dimension_semantics<arbitrary>], iteration_bounds = array<i64: 2, 1>, scalar_prefetch = 0 : i64, scratch_operands = 0 : i64, tpu.core_type = #tpu.core_type<tc>, window_params = [{transform_indices = @transform_0, window_bounds = array<i64: 8, 256>}, {transform_indices = @transform_1, window_bounds = array<i64: 8, 256>}, {transform_indices = @transform_2, window_bounds = array<i64: 1, 8, 256>}]} {
    %c0_i32 = arith.constant 0 : i32
    %0 = arith.cmpi eq, %arg1, %c0_i32 : i32
    %1 = arith.extui %0 : i1 to i32
    %c0_i32_0 = arith.constant 0 : i32
    %2 = arith.cmpi ne, %1, %c0_i32_0 : i32
    scf.if %2 {
      %cst_15 = arith.constant 0.000000e+00 : f32
      %30 = vector.broadcast %cst_15 : f32 to vector<1x8x256xf32>
      %c0_16 = arith.constant 0 : index
      %c0_17 = arith.constant 0 : index
      %c0_18 = arith.constant 0 : index
      %31 = vector.load %arg4[%c0_16, %c0_17, %c0_18] : memref<1x8x256xf32, #tpu.memory_space<vmem>>, vector<1x8x256xf32>
      tpu.vector_store %arg4[%c0_16, %c0_17, %c0_18], %30 {strides = array<i32>} : memref<1x8x256xf32, #tpu.memory_space<vmem>>, vector<1x8x256xf32>,
    } else {
    }
    %c0 = arith.constant 0 : index
    %c0_1 = arith.constant 0 : index
    %3 = vector.load %arg2[%c0, %c0_1] : memref<8x256xf32, #tpu.memory_space<vmem>>, vector<8x256xf32>
    %c0_2 = arith.constant 0 : index
    %c0_3 = arith.constant 0 : index
    %4 = vector.load %arg3[%c0_2, %c0_3] : memref<8x256xf32, #tpu.memory_space<vmem>>, vector<8x256xf32>
    %5 = math.absf %3 : vector<8x256xf32>
    %cst = arith.constant 0.000000e+00 : f32
    %6 = vector.broadcast %cst : f32 to vector<8x256xf32>
    %7 = arith.subf %6, %5 : vector<8x256xf32>
    %8 = math.exp %7 : vector<8x256xf32>
    %cst_4 = arith.constant 0.000000e+00 : f32
    %9 = vector.broadcast %cst_4 : f32 to vector<8x256xf32>
    %10 = arith.maximumf %3, %9 : vector<8x256xf32>
    %11 = arith.mulf %3, %4 : vector<8x256xf32>
    %12 = arith.subf %10, %11 : vector<8x256xf32>
    %13 = math.log1p %8 : vector<8x256xf32>
    %14 = arith.addf %12, %13 : vector<8x256xf32>
    %cst_5 = arith.constant 0.000000e+00 : f32
    %15 = vector.broadcast %cst_5 : f32 to vector<8x256xf32>
    %16 = arith.subf %15, %14 : vector<8x256xf32>
    %17 = math.exp %16 : vector<8x256xf32>
    %cst_6 = arith.constant 1.000000e+00 : f32
    %18 = vector.broadcast %cst_6 : f32 to vector<8x256xf32>
    %19 = arith.subf %18, %17 : vector<8x256xf32>
    %20 = arith.mulf %19, %19 : vector<8x256xf32>
    %cst_7 = arith.constant 2.500000e-01 : f32
    %21 = vector.broadcast %cst_7 : f32 to vector<8x256xf32>
    %22 = arith.mulf %21, %20 : vector<8x256xf32>
    %23 = arith.mulf %22, %14 : vector<8x256xf32>
    %24 = vector.shape_cast %23 : vector<8x256xf32> to vector<1x8x256xf32>
    %cst_8 = arith.constant dense<0.000000e+00> : vector<8x256xf32>
    %25 = vector.multi_reduction <add>, %24, %cst_8 [0] : vector<1x8x256xf32> to vector<8x256xf32>
    %c0_9 = arith.constant 0 : index
    %c0_10 = arith.constant 0 : index
    %c0_11 = arith.constant 0 : index
    %26 = vector.load %arg4[%c0_9, %c0_10, %c0_11] : memref<1x8x256xf32, #tpu.memory_space<vmem>>, vector<1x8x256xf32>
    %27 = vector.shape_cast %25 : vector<8x256xf32> to vector<1x8x256xf32>
    %28 = arith.addf %26, %27 : vector<1x8x256xf32>
    %c0_12 = arith.constant 0 : index
    %c0_13 = arith.constant 0 : index
    %c0_14 = arith.constant 0 : index
    %29 = vector.load %arg4[%c0_12, %c0_13, %c0_14] : memref<1x8x256xf32, #tpu.memory_space<vmem>>, vector<1x8x256xf32>
    tpu.vector_store %arg4[%c0_12, %c0_13, %c0_14], %28 {strides = array<i32>} : memref<1x8x256xf32, #tpu.memory_space<vmem>>, vector<1x8x256xf32>,
    return
  }
  func.func @transform_0(%arg0: i32, %arg1: i32) -> (i32, i32) {
    %c0_i32 = arith.constant 0 : i32
    return %arg0, %arg1 : i32, i32
  }
  func.func @transform_1(%arg0: i32, %arg1: i32) -> (i32, i32) {
    %c0_i32 = arith.constant 0 : i32
    return %arg0, %arg1 : i32, i32
  }
  func.func @transform_2(%arg0: i32, %arg1: i32) -> (i32, i32, i32) {
    %c0_i32 = arith.constant 0 : i32
    %c0_i32_0 = arith.constant 0 : i32
    %c0_i32_1 = arith.constant 0 : i32
    return %arg0, %c0_i32, %c0_i32_0 : i32, i32, i32
  }
}

</mosaic_0001>

<bundles_post_ra>
// kernel: tpu_custom_call.1
= control target key start
LH: loop header
LB: loop body
LE: loop exit
PB: predicated region body
PF: predicated region fallthrough
CT: control target
= control target key end

     0   :  { %7 = vsyncpa [#allocation3], 0  ;;  %s901_s0 = inlined_call_operand.hbm [shape: f32[16,256], index: 0, kind: input, shape index: {}]   ;;  %s902_s1 = inlined_call_operand.hbm [shape: f32[16,256], index: 1, kind: input, shape index: {}]   ;;  %s903_s2 = inlined_call_operand.hbm [shape: f32[2,8,256], index: 2, kind: output, shape index: {}]  }
   0x1   :  { %9 = vsyncpa [#allocation3 + $0x1], 0 }
   0x2   :  { %10 = vsyncpa [#allocation6], 0 }
   0x3   :  { %12 = vsyncpa [#allocation6 + $0x1], 0 }
   0x4   :  { %13 = vsyncpa [#allocation4], 0 }
   0x5   :  { %15 = vsyncpa [#allocation4 + $0x1], 0  ;;  %s676_s9 = smov 0   ;;  %s678_s10 = smov 0  }
   0x6   :  { %s680_s11 = smov 0   ;;  %s682_s12 = smov 0  }
   0x7   :  { %s684_s13 = smov 0   ;;  %s686_s14 = smov 0  }
   0x8 LB: > { %s408_s15 = sadd.s32 4294967295, %s656_s14   ;;  %s409_s16 = sadd.s32 4294967294, %s656_s14   ;;  %s656_s14 = sphi %s686_s14, %s21_s14   ;;  %s652_s13 = sphi %s684_s13, %s923_s13   ;;  %s648_s12 = sphi %s682_s12, %s922_s12   ;;  %s644_s11 = sphi %s680_s11, %s921_s11   ;;  %s640_s10 = sphi %s678_s10, %s920_s10   ;;  %s636_s9 = sphi %s676_s9, %s919_s9  }
   0x9   : > { %s33_s17 = sadd.s32 1, %s652_s13  ;;  %s42_s18 = sadd.s32 1, %s644_s11 }
   0xa   : > { %p35_p0 = scmp.ge.s32.totalorder %s33_s17, 2  ;;  %p49_p1 = scmp.ne.s32.totalorder %s644_s11, %s640_s10 }
   0xb   : > { %p50_p2 = scmp.eq.s32.totalorder %s656_s14, 0  ;;  %p55_p3 = scmp.ne.s32.totalorder %s640_s10, %s636_s9 }
   0xc   : > { %s925_s17 = smov (%p35_p0, %s33_s17), 0  ;;  %p56_p5 = scmp.eq.s32.totalorder %s408_s15, 0 }
   0xd   : > { %p717_p4 = por %p50_p2, %p49_p1  ;;  %s37_s20 = ssub.s32 %s652_s13, %s925_s17 }
   0xe   : > { %p107_p6 = scmp.eq.s32.totalorder %s408_s15, 1  ;;  %p40_p7 = scmp.eq.s32.totalorder %s37_s20, 0 }
   0xf   : > { %p723_p8 = por %p56_p5, %p55_p3  ;;  %p113_p10 = scmp.eq.s32.totalorder %s409_s16, 1 }
  0x10   : > { %p727_p9 = por %p107_p6, %p49_p1  ;;  %p447_p13 = scmp.lt.s32.totalorder %s656_s14, 2 }
  0x11   : > { %s907_s21 = scalar_select %p723_p8, 1, 0 }
  0x12   : > { %s908_s22 = scalar_select %p727_p9, 1, 0 }
  0x13   : > { %s732_s23 = scalar_select %p40_p7, %s644_s11, %s42_s18  }
  0x14   : > { %p734_p11 = por %p113_p10, %p55_p3  ;;  %s741_s25 = sand.u32 1, %s644_s11  }
  0x15   : > { %s412_s26 = sshll.u32 %s741_s25, 4  ;;  %s427_s27 = sshll.u32 %s652_s13, 8 }
  0x16   : > { %s909_s24 = scalar_select %p734_p11, 1, 0 }
  0x17   : > { %s750_s30 = scalar_lea.hbm %s901_s0, %s427_s27  ;;  %s137_s3 = scalar_lea.vmem [#allocation2], %s412_s26 }
  0x18   : > { %s147_s4 = sshll.u32 %s137_s3, 4  ;;  %p758_p0 = pnand %p447_p13, %p717_p4  ;;  %s754_s4 = int_to_ptr.vmem [resolvable:$true] %s147_s4 }
  0x19   : > { %s134_s6 = scalar_lea.sflag [#allocation3], %s741_s25  ;;  %s510_s7 = scalar_lea.hbm %s750_s30, 256 }
  0x1a   : > { %p511_p3 = scmp.ne.s32.totalorder %s750_s30, %s510_s7  ;;  %p512_p5 = pneg %p758_p0 }
  0x1b   : > { %s515_s16 = scalar_lea.hbm %s901_s0, 512  ;;  %p516_p4 = scmp.lt.u32.totalorder %s750_s30, %s901_s0 }
  0x1c   : > { %p513_p6 = pnand %p512_p5, %p511_p3  ;;  %p517_p10 = scmp.lt.u32.totalorder %s515_s16, %s510_s7 }
  0x1d   : > { %p519_p12 = scmp.lt.u32.totalorder %s510_s7, %s750_s30 }
  0x1e   : > { %p514_p7 = pneg %p513_p6  ;;  %p518_p13 = por %p517_p10, %p516_p4 }
  0x20   : > { %p520_p1 = por %p519_p12, %p518_p13 }
  0x22   : > { %p521_p2 = pnand %p520_p1, %p514_p7 }
  0x24   : > { %524 = shalt.err (!%p521_p2)
}
  0x25   : > { %s525_s20 = scalar_lea.vmem %s754_s4, 256  ;;  %s658_s28 = smov [#allocation2]  }
  0x26   : > { %p526_p3 = scmp.ne.s32.totalorder %s754_s4, %s525_s20  ;;  %s530_s29 = sshll.u32 %s658_s28, 4  ;;  %s531_s29 = int_to_ptr.vmem [resolvable:$false] %s530_s29 }
  0x27   : > { %s532_s3 = scalar_lea.vmem %s531_s29, 512  ;;  %p533_p9 = scmp.lt.s32.totalorder %s754_s4, %s531_s29 }
  0x28   : > { %p528_p6 = pnand %p526_p3, %p512_p5  ;;  %p534_p4 = scmp.lt.s32.totalorder %s532_s3, %s525_s20 }
  0x2a   : > { %p529_p11 = pneg %p528_p6  ;;  %p535_p10 = por %p534_p4, %p533_p9 }
  0x2c   : > { %p536_p12 = pnand %p535_p10, %p529_p11 }
  0x2e   : > { %539 = shalt.err (!%p536_p12)
}
  0x2f   : > { %439 = dma.hbm_to_vmem [thread:$0]  (!%p758_p0), %s750_s30, 256, %s754_s4, %s134_s6  }
  0x30   : > { %p911_p1 = scmp.lt.s32.totalorder %s656_s14, 3  ;;  %p912_p2 = scmp.ge.s32.totalorder %s656_s14, 1 }
  0x31   : > { %s803_s16 = scalar_lea.hbm %s902_s1, %s427_s27  ;;  %s158_s18 = scalar_lea.vmem [#allocation5], %s412_s26 }
  0x32   : > { %p794_p7 = pnand %p912_p2, %p911_p1  ;;  %s168_s19 = sshll.u32 %s158_s18, 4  ;;  %s169_s19 = int_to_ptr.vmem [resolvable:$true] %s168_s19 }
  0x33   : > { %s155_s30 = scalar_lea.sflag [#allocation6], %s741_s25  ;;  %s540_s4 = scalar_lea.hbm %s803_s16, 256 }
  0x34   : > { %s913_s7 = scalar_select %p794_p7, 1, 0 }
  0x35   : > { %p541_p9 = scmp.ne.s32.totalorder %s803_s16, %s540_s4  ;;  %s545_s27 = scalar_lea.hbm %s902_s1, 512 }
  0x36   : > { %p546_p3 = scmp.lt.u32.totalorder %s803_s16, %s902_s1  ;;  %p547_p6 = scmp.lt.u32.totalorder %s545_s27, %s540_s4 }
  0x37   : > { %p543_p11 = pnand %p541_p9, %p512_p5  ;;  %p549_p10 = scmp.lt.u32.totalorder %s540_s4, %s803_s16 }
  0x38   : > { %p548_p4 = por %p547_p6, %p546_p3 }
  0x39   : > { %p544_p13 = pneg %p543_p11 }
  0x3a   : > { %p550_p12 = por %p549_p10, %p548_p4 }
  0x3c   : > { %p551_p1 = pnand %p550_p12, %p544_p13 }
  0x3e   : > { %554 = shalt.err (!%p551_p1)
}
  0x3f   : > { %s555_s25 = scalar_lea.vmem %s169_s19, 256  ;;  %s659_s26 = smov [#allocation5]  }
  0x40   : > { %p556_p2 = scmp.ne.s32.totalorder %s169_s19, %s555_s25  ;;  %s560_s3 = sshll.u32 %s659_s26, 4  ;;  %s561_s3 = int_to_ptr.vmem [resolvable:$false] %s560_s3 }
  0x41   : > { %s562_s8 = scalar_lea.vmem %s561_s3, 512  ;;  %p563_p8 = scmp.lt.s32.totalorder %s169_s19, %s561_s3 }
  0x42   : > { %p558_p9 = pnand %p556_p2, %p512_p5  ;;  %p564_p7 = scmp.lt.s32.totalorder %s562_s8, %s555_s25 }
  0x44   : > { %p559_p11 = pneg %p558_p9  ;;  %p565_p3 = por %p564_p7, %p563_p8 }
  0x46   : > { %p566_p6 = pnand %p565_p3, %p559_p11 }
  0x48   : > { %569 = shalt.err (!%p566_p6)
}
  0x49   : > { %442 = dma.hbm_to_vmem [thread:$0]  (!%p758_p0), %s803_s16, 256, %s169_s19, %s155_s30  }
  0x4a   : > { %p914_p13 = scmp.ne.s32.totalorder %s913_s7, 0 }
  0x4b   : > { %s830_s15 = sand.u32 (!%p914_p13), 1, %s640_s10   ;;  %p915_p8 = scmp.ne.s32.totalorder (!%p914_p13), %s907_s21, 0 }
  0x4c   : > { %177 = sbr.rel (%p914_p13) target bundleno = 160 (0xa0), region = 28  ;;  %s833_s18 = sshll.u32 (!%p914_p13), %s830_s15, 4 }
  0x4d   : > { %s180_s4 = scalar_lea.sflag (!%p914_p13), [#allocation3], %s830_s15  ;;  %s183_s6 = scalar_lea.vmem (!%p914_p13), [#allocation2], %s833_s18 }
  0x53   : > { %623 = dma.done.wait (%p915_p8), %s180_s4, 256  }
  0x54   : > { %625 = vsyncadd (%p915_p8), %s180_s4, 4294967040  ;;  %s189_s5 = scalar_lea.sflag [#allocation6], %s830_s15  ;;  %s192_s7 = scalar_lea.vmem [#allocation5], %s833_s18 }
  0x55   : > { %627 = dma.done.wait (%p915_p8), %s189_s5, 256  }
  0x56   : > { %629 = vsyncadd (%p915_p8), %s189_s5, 4294967040  ;;  %v226_v0 = vld [vmem:[%s183_s6] sm:$0xff]  ;;  %v227_v1 = vld [vmem:[%s183_s6 + $0x8] sm:$0xff]  ;;  %s429_s21 = sshll.u32 %s648_s12, 8  ;;  %s217_s16 = scalar_lea.vmem [#allocation7], %s833_s18 }
  0x57   : > { %v230_v2 = vand.u32 2147483647, %v226_v0  ;;  %v231_v3 = vand.u32 2147483647, %v227_v1  ;;  %v228_v14 = vld [vmem:[%s192_s7] sm:$0xff]  ;;  %v229_v15 = vld [vmem:[%s192_s7 + $0x8] sm:$0xff]  ;;  %s852_s27 = scalar_lea.hbm %s903_s2, %s429_s21 }
  0x58   : > { %v238_v17 = vmax.f32 %v226_v0, 0.0  ;;  %v240_v18 = vmul.f32 %v228_v14, %v226_v0  ;;  %v239_v21 = vmax.f32 %v227_v1, 0.0  ;;  %v241_v22 = vmul.f32 %v229_v15, %v227_v1  ;;  %s301_s19 = sshll.u32 %s217_s16, 4  ;;  %s287_s28 = scalar_lea.sflag [#allocation4], %s830_s15  ;;  %s854_s19 = int_to_ptr.vmem [resolvable:$true] %s301_s19 }
  0x59   : > { %v232_v4 = vsub.f32 0.0, %v230_v2  ;;  %v233_v5 = vsub.f32 0.0, %v231_v3  ;;  %s570_s29 = scalar_lea.vmem %s854_s19, 256  ;;  %p916_p5 = scmp.ne.s32.totalorder %s908_s22, 0 }
  0x5a   : > { %v242_v26 = vsub.f32 %v238_v17, %v240_v18  ;;  %v243_v30 = vsub.f32 %v239_v21, %v241_v22  ;;  %p571_p0 = scmp.ne.s32.totalorder %s854_s19, %s570_s29  ;;  %s660_s12 = smov [#allocation7]  }
  0x5b   : > { %v234_v6 = vmul.f32 1.442695, %v232_v4  ;;  %v236_v7 = vmul.f32 1.442695, %v233_v5  ;;  %s574_s25 = sshll.u32 %s660_s12, 4  ;;  %s575_s25 = int_to_ptr.vmem [resolvable:$false] %s574_s25 }
  0x5c   : > { %p572_p7 = pnand %p571_p0, %p916_p5  ;;  %s576_s26 = scalar_lea.vmem %s575_s25, 512 }
  0x5d   : > { %498 = vpow2.f32 %v234_v6  ;;  %p577_p10 = scmp.lt.s32.totalorder %s854_s19, %s575_s25  ;;  %p578_p12 = scmp.lt.s32.totalorder %s576_s26, %s570_s29 }
  0x5e   : > { %500 = vpow2.f32 %v236_v7  ;;  %p573_p4 = pneg %p572_p7 }
  0x5f   : > { %p579_p1 = por %p578_p12, %p577_p10 }
  0x61   : > { %p580_p2 = pnand %p579_p1, %p573_p4 }
  0x67   : > { %v499_v8 = vpop.eup %498 }
  0x68   : > { %v501_v9 = vpop.eup %500  ;;  %v244_v10 = vadd.f32 1.0, %v499_v8  ;;  %v247_v12 = vmul.f32 -0.5, %v499_v8  ;;  %v250_v19 = vand.u32 2147483647, %v499_v8 }
  0x69   : > { %v253_v11 = vadd.f32 1.0, %v501_v9  ;;  %v256_v13 = vmul.f32 -0.5, %v501_v9  ;;  %v259_v23 = vand.u32 2147483647, %v501_v9 }
  0x6a   : > { %502 = vlog2.f32 %v244_v10  ;;  %v248_v16 = vadd.f32 1.0, %v247_v12  ;;  %vm251_vm0 = vcmp.lt.f32.partialorder %v250_v19, 0.0004427343 }
  0x6b   : > { %504 = vlog2.f32 %v253_v11  ;;  %v257_v20 = vadd.f32 1.0, %v256_v13  ;;  %vm260_vm1 = vcmp.lt.f32.partialorder %v259_v23, 0.0004427343 }
  0x6c   : > { %v249_v24 = vmul.f32 %v499_v8, %v248_v16 }
  0x6d   : > { %v258_v27 = vmul.f32 %v501_v9, %v257_v20 }
  0x74   : > { %v503_v25 = vpop.eup %502 }
  0x75   : > { %v505_v28 = vpop.eup %504  ;;  %v246_v29 = vmul.f32 0.6931472, %v503_v25 }
  0x76   : > { %v255_v31 = vmul.f32 0.6931472, %v505_v28 }
  0x77   : > { %v252_v32 = vsel %vm251_vm0, %v249_v24, %v246_v29 }
  0x78   : > { %v262_v33 = vadd.f32 %v252_v32, %v242_v26  ;;  %v261_v34 = vsel %vm260_vm1, %v258_v27, %v255_v31 }
  0x79   : > { %v263_v35 = vadd.f32 %v261_v34, %v243_v30 }
  0x7a   : > { %v264_v36 = vsub.f32 0.0, %v262_v33 }
  0x7b   : > { %v265_v37 = vsub.f32 0.0, %v263_v35 }
  0x7c   : > { %v266_v38 = vmul.f32 1.442695, %v264_v36 }
  0x7d   : > { %v268_v39 = vmul.f32 1.442695, %v265_v37 }
  0x7e   : > { %506 = vpow2.f32 %v266_v38 }
  0x7f   : > { %508 = vpow2.f32 %v268_v39 }
  0x88   : > { %v507_v40 = vpop.eup %506 }
  0x89   : > { %v509_v41 = vpop.eup %508  ;;  %v270_v42 = vsub.f32 1.0, %v507_v40 }
  0x8a   : > { %v271_v43 = vsub.f32 1.0, %v509_v41 }
  0x8b   : > { %v272_v44 = vmul.f32 %v270_v42, %v270_v42 }
  0x8c   : > { %v273_v45 = vmul.f32 %v271_v43, %v271_v43 }
  0x8d   : > { %v274_v46 = vmul.f32 0.25, %v272_v44 }
  0x8e   : > { %v275_v47 = vmul.f32 0.25, %v273_v45 }
  0x8f   : > { %v276_v48 = vmul.f32 %v274_v46, %v262_v33 }
  0x90   : > { %v277_v49 = vmul.f32 %v275_v47, %v263_v35 }
  0x91   : > { %284 = vst [vmem:[%s217_s16] sm:$0xff] %v276_v48 }
  0x92   : > { %285 = vst [vmem:[%s217_s16 + $0x8] sm:$0xff] %v277_v49 }
  0x93   : > { %583 = shalt.err (!%p580_p2)
}
  0x94   : > { %s584_s3 = scalar_lea.hbm %s852_s27, 256  ;;  %s588_s18 = scalar_lea.hbm %s903_s2, 512 }
  0x95   : > { %p585_p9 = scmp.ne.s32.totalorder %s852_s27, %s584_s3  ;;  %p589_p6 = scmp.lt.u32.totalorder %s852_s27, %s903_s2 }
  0x96   : > { %p590_p13 = scmp.lt.u32.totalorder %s588_s18, %s584_s3  ;;  %p592_p0 = scmp.lt.u32.totalorder %s584_s3, %s852_s27 }
  0x97   : > { %p586_p11 = pnand %p585_p9, %p916_p5 }
  0x98   : > { %p591_p8 = por %p590_p13, %p589_p6 }
  0x99   : > { %p587_p3 = pneg %p586_p11 }
  0x9a   : > { %p593_p7 = por %p592_p0, %p591_p8 }
  0x9c   : > { %p594_p4 = pnand %p593_p7, %p587_p3 }
  0x9e   : > { %597 = shalt.err (!%p594_p4)
}
  0x9f   : > { %434 = dma.vmem_to_hbm [thread:$0]  (%p916_p5), %s854_s19, 256, %s852_s27, %s287_s28  }
  0xa0 PF: > { %s313_s5 = sand.u32 1, %s636_s9   ;;  %p917_p10 = scmp.ne.s32.totalorder %s909_s24, 0 }
  0xa1   : > { %p918_p12 = scmp.ge.s32.totalorder %s656_s14, 2  ;;  %s314_s7 = scalar_lea.sflag [#allocation4], %s313_s5 }
  0xa3   : > { %p444_p1 = pnand %p918_p12, %p917_p10 }
  0xa5   : > { %631 = dma.done.wait (!%p444_p1), %s314_s7, 256  }
  0xa6   : > { %633 = vsyncadd (!%p444_p1), %s314_s7, 4294967040  ;;  %s21_s14 = sadd.s32 1, %s656_s14   ;;  %s919_s9 = smov %s640_s10 }
  0xa7   : > { %p18_p2 = scmp.ge.s32.totalorder %s21_s14, 4   ;;  %s920_s10 = smov %s644_s11 }
  0xa8   : > { %s921_s11 = smov %s732_s23  ;;  %s922_s12 = smov %s652_s13 }
  0xa9   : > { %s923_s13 = smov %s925_s17  ;;  %20 = sbr.rel (!%p18_p2) target bundleno = 8 (0x8), region = 90 }
  0xb0   :  { %319 = vsyncpa [#allocation3], 1 }
  0xb1   :  { %321 = vsyncpa [#allocation3 + $0x1], 1 }
  0xb2   :  { %322 = vsyncpa [#allocation6], 1 }
  0xb3   :  { %324 = vsyncpa [#allocation6 + $0x1], 1 }
  0xb4   :  { %325 = vsyncpa [#allocation4], 1 }
  0xb5   :  { %327 = vsyncpa [#allocation4 + $0x1], 1 }

</bundles_post_ra>
